<compile_context>
chip_gen: v7x
topology: tpu7x:2x2x1
jax: 0.10.0
libtpu: 0.0.40
codegen_flags: <defaults>
</compile_context>

<pallas_src>
import functools

import jax
import jax.numpy as jnp
import numpy as np
from jax.experimental import pallas as pl
from jax.experimental.pallas import tpu as pltpu


MATMUL_DTYPE = jnp.bfloat16   # set to jnp.float32 for exact PyTorch numerics


def dgc_kernel(x_ref, wqkv_ref, bias_ref, wfc_ref, wdw_ref, gamma_ref, o_ref,
               *, bsub, n_sub, n_feat, dim, out_feat, matmul_dtype):
    f32 = jnp.float32
    md = matmul_dtype
    d3 = 3 * dim

    # Resident weights: constant block index -> DMA'd once, reused by every
    # grid step / sub-chunk.  Shipped pre-transposed in the matmul dtype.
    wqkv = wqkv_ref[...]                      # (D, 3D)
    wfc_t = wfc_ref[...]                      # (2N, D)
    wfcg_t = wfc_t[:n_feat, :]                # (N, D)  rows applied to x_glb
    wfcx_t = wfc_t[n_feat:, :]                # (N, D)  rows applied to x
    wdw_t = wdw_ref[...]                      # (N, O)
    bias = bias_ref[...]                      # (3, max(3D, O)) f32, zero-padded
    bqkv = bias[0:1, :d3]                     # (1, 3D)
    bfc = bias[1:2, :dim]                     # (1, D)
    bdw = bias[2:3, :out_feat]                # (1, O)
    gamma = gamma_ref[0]                      # SMEM scalar

    def process(c):
        if n_sub == 1:
            start = 0
        else:
            start = pl.multiple_of(c * bsub, bsub)
        x = x_ref[pl.ds(start, bsub)]                       # (bsub, N, D) f32
        x_rows = x.reshape(bsub * n_feat, dim).astype(md)   # (bsub*N, D)

        # --- fused qkv projection: one (bsub*N, D) @ (D, 3D) matmul --------
        qkv = jnp.dot(x_rows, wqkv, preferred_element_type=f32) + bqkv
        q = qkv[:, 0 * dim:1 * dim].reshape(bsub, n_feat, dim)
        k = qkv[:, 1 * dim:2 * dim].reshape(bsub, n_feat, dim)
        v = qkv[:, 2 * dim:3 * dim].reshape(bsub, n_feat, dim)

        # --- self-attention over the channel axis (per-element bmm) --------
        energy = jnp.einsum('bnd,bmd->bnm', q.astype(md), k.astype(md),
                            preferred_element_type=f32)     # (bsub, N, N)
        energy = energy - jnp.max(energy, axis=-1, keepdims=True)
        p = jnp.exp(energy)
        attn = p * pl.reciprocal(jnp.sum(p, axis=-1, keepdims=True),
                                 approx=True)
        out = jnp.einsum('bnm,bmd->bnd', attn.astype(md), v.astype(md),
                         preferred_element_type=f32)        # (bsub, N, D)

        x_glb = gamma * out + x                             # (bsub, N, D) f32

        # --- dynamic adjacency, concat-free, as wide 2D matmuls ------------
        # adj_T[(b,d), e] = sigmoid(sum_n x_glb[b,n,d]*wfc[e,n]
        #                           + sum_n x[b,n,d]*wfc[e,N+n] + bfc[e])
        xg_t = x_glb.transpose(0, 2, 1).reshape(bsub * dim, n_feat).astype(md)
        x_t = x.transpose(0, 2, 1).reshape(bsub * dim, n_feat).astype(md)
        adj_t = jax.nn.sigmoid(
            jnp.dot(xg_t, wfcg_t, preferred_element_type=f32)
            + jnp.dot(x_t, wfcx_t, preferred_element_type=f32)
            + bfc)                                          # (bsub*D, D)
        adj_t = adj_t.reshape(bsub, dim, dim)               # [b, d, e]

        # --- dynamic GCN: y[b,n,d] = sum_e x[b,n,e] * adj[b,e,d] -----------
        y = jnp.einsum('bne,bde->bnd', x.astype(md), adj_t.astype(md),
                       preferred_element_type=f32)          # (bsub, N, D)
        y = jnp.where(y > 0, y, 0.2 * y)

        # --- 1x1 conv (dynamic_weight) as one wide 2D matmul ---------------
        y_t = y.transpose(0, 2, 1).reshape(bsub * dim, n_feat).astype(md)
        z_t = jnp.dot(y_t, wdw_t, preferred_element_type=f32) + bdw
        z_t = jnp.where(z_t > 0, z_t, 0.2 * z_t)            # (bsub*D, O)

        # --- lane-dense store: out[b, o*D + d] = z[b, o, d] -----------------
        z_bod = z_t.reshape(bsub, dim, out_feat).transpose(0, 2, 1)
        for o in range(out_feat):
            o_ref[0, c, :, pl.ds(o * dim, dim)] = (
                z_bod[:, o, :].astype(o_ref.dtype))

    if n_sub == 1:
        process(0)
    else:
        @pl.loop(0, n_sub)
        def _(c):
            process(c)


def _plan_batch_tiling(batch, *, bsub_max=8, bt_max=128):
    """Returns (grid_steps, batch_block, compute_sub_block, padded_batch)."""
    if batch <= 1:
        return 1, 1, 1, 1
    # >=2 grid steps whenever B > 1 (megacore sharding on v7x); even count so
    # both TensorCores get the same number of steps.
    g = max(2, -(-batch // bt_max))
    if g % 2:
        g += 1
    bt = -(-batch // g)                   # per-step DMA block (batch elements)
    bsub = min(bsub_max, bt)
    while bt % bsub:                      # largest sub-tile <= bsub_max dividing bt
        bsub -= 1
    bp = g * bt                           # padded batch
    return g, bt, bsub, bp


def dynamic_graph_convolution(x, params, *, matmul_dtype=MATMUL_DTYPE,
                              bsub_max=8, bt_max=128):
    """x: (B, N, D) float32.  Returns (B, O, D) float32."""
    B, N, D = x.shape
    wqkv = params["wqkv"]          # (3D, D)  nn.Linear(dim, 3*dim).weight
    bqkv = params["bqkv"]          # (3D,)
    gamma = params["gamma"]        # (1,)
    wfc = params["wfc"]            # (D, 2N)  Conv1d(2N, D, 1).weight squeezed
    bfc = params["bfc"]            # (D,)
    wdw = params["wdw"]            # (O, N)   Conv1d(N, O, 1).weight squeezed
    bdw = params["bdw"]            # (O,)
    O = wdw.shape[0]
    md = matmul_dtype

    g, bt, bsub, bp = _plan_batch_tiling(B, bsub_max=bsub_max, bt_max=bt_max)
    n_sub = bt // bsub
    if bp != B:
        x = jnp.pad(x, ((0, bp - B), (0, 0), (0, 0)))

    # Kernel-friendly weight layouts: pre-transposed, matmul dtype, and the
    # three tiny bias vectors consolidated into one (3, max(3D, O)) table.
    wqkv_t = wqkv.T.astype(md)             # (D, 3D)   fused qkv RHS
    wfc_t = wfc.T.astype(md)               # (2N, D)   rows [:N]->x_glb, [N:]->x
    wdw_t = wdw.T.astype(md)               # (N, O)
    bw = max(3 * D, O)
    bias_all = jnp.zeros((3, bw), jnp.float32)
    bias_all = bias_all.at[0, :3 * D].set(bqkv.astype(jnp.float32))
    bias_all = bias_all.at[1, :D].set(bfc.astype(jnp.float32))
    bias_all = bias_all.at[2, :O].set(bdw.astype(jnp.float32))
    gamma1 = gamma.reshape(1).astype(jnp.float32)

    kernel = functools.partial(dgc_kernel, bsub=bsub, n_sub=n_sub, n_feat=N,
                               dim=D, out_feat=O, matmul_dtype=md)

    def resident(arr):   # whole-array block, constant index -> DMA'd once
        return pl.BlockSpec(arr.shape, lambda i, nd=arr.ndim: (0,) * nd)

    # Explicit VMEM budget: double-buffered x/out blocks + resident weights,
    # plus generous headroom for spilled f32 intermediates of one sub-chunk.
    w_itemsize = jnp.dtype(md).itemsize
    blk_bytes = bt * N * D * 4 + bt * O * D * 4
    w_bytes = ((wqkv_t.size + wfc_t.size + wdw_t.size) * w_itemsize
               + bias_all.size * 4)
    vmem_limit = int(min(48 * 2 ** 20,
                         4 * blk_bytes + 2 * w_bytes + 16 * 2 ** 20))

    out = pl.pallas_call(
        kernel,
        out_shape=jax.ShapeDtypeStruct((g, n_sub, bsub, O * D), jnp.float32),
        grid_spec=pltpu.PrefetchScalarGridSpec(
            num_scalar_prefetch=0,
            grid=(g,),
            in_specs=[
                pl.BlockSpec((bt, N, D), lambda i: (i, 0, 0)),
                resident(wqkv_t),
                resident(bias_all),
                resident(wfc_t),
                resident(wdw_t),
                pl.BlockSpec(memory_space=pltpu.MemorySpace.SMEM),
            ],
            out_specs=pl.BlockSpec((1, n_sub, bsub, O * D),
                                   lambda i: (i, 0, 0, 0)),
        ),
        compiler_params=pltpu.CompilerParams(
            dimension_semantics=("parallel",),
            vmem_limit_bytes=vmem_limit),
    )(x, wqkv_t, bias_all, wfc_t, wdw_t, gamma1)

    # (g, n_sub, bsub, O*D) -> (Bp, O, D): contiguous reshapes, then drop pad.
    return out.reshape(bp, O, D)[:B]


def reference_forward(x, params, matmul_dtype=jnp.float32):
    """Pure-JAX forward reproducing the PyTorch module math.

    With matmul_dtype=float32 this is the exact module math; with bfloat16 it
    mirrors the kernel's reduced-precision matmul operands (f32 accumulation).
    """
    md = matmul_dtype
    f32 = jnp.float32
    D = x.shape[-1]
    wqkv, bqkv = params["wqkv"], params["bqkv"]
    gamma = params["gamma"][0]
    wfc, bfc = params["wfc"], params["bfc"]
    wdw, bdw = params["wdw"], params["bdw"]

    qkv = jnp.einsum('bnd,ed->bne', x.astype(md), wqkv.astype(md),
                     preferred_element_type=f32) + bqkv[None, None, :]
    q, k, v = qkv[..., :D], qkv[..., D:2 * D], qkv[..., 2 * D:]
    energy = jnp.einsum('bnd,bmd->bnm', q.astype(md), k.astype(md),
                        preferred_element_type=f32)
    attn = jax.nn.softmax(energy, axis=-1)
    out = jnp.einsum('bnm,bmd->bnd', attn.astype(md), v.astype(md),
                     preferred_element_type=f32)
    x_glb = gamma * out + x
    x_cat = jnp.concatenate([x_glb, x], axis=1)                    # (B, 2N, D)
    adj = jax.nn.sigmoid(
        jnp.einsum('en,bnd->bed', wfc.astype(md), x_cat.astype(md),
                   preferred_element_type=f32) + bfc[None, :, None])
    y = jnp.einsum('bne,bed->bnd', x.astype(md), adj.astype(md),
                   preferred_element_type=f32)
    y = jnp.where(y > 0, y, 0.2 * y)
    z = (jnp.einsum('on,bnd->bod', wdw.astype(md), y.astype(md),
                    preferred_element_type=f32) + bdw[None, :, None])
    z = jnp.where(z > 0, z, 0.2 * z)
    return z


def make_params(key, in_features, out_features, dim):
    ks = jax.random.split(key, 6)
    scale = 0.1
    # nn.Linear(dim, 3*dim): weight (3D, D), bias (3D,)
    wqkv = scale * jax.random.normal(ks[0], (3 * dim, dim), jnp.float32)
    bqkv = scale * jax.random.normal(ks[1], (3 * dim,), jnp.float32)
    # nn.Parameter(torch.zeros(1)) -> nonzero so the attention path is exercised
    gamma = jnp.full((1,), 0.5, jnp.float32)
    # nn.Conv1d(in_features*2, dim, 1): weight (D, 2N, 1) squeezed, bias (D,)
    wfc = scale * jax.random.normal(ks[2], (dim, 2 * in_features), jnp.float32)
    bfc = scale * jax.random.normal(ks[3], (dim,), jnp.float32)
    # nn.Conv1d(in_features, out_features, 1): weight (O, N, 1) squeezed, bias (O,)
    wdw = scale * jax.random.normal(ks[4], (out_features, in_features), jnp.float32)
    bdw = scale * jax.random.normal(ks[5], (out_features,), jnp.float32)
    return {"wqkv": wqkv, "bqkv": bqkv, "gamma": gamma,
            "wfc": wfc, "bfc": bfc, "wdw": wdw, "bdw": bdw}


if __name__ == "__main__":
    B, in_features, out_features, dim = 2, 8, 8, 32

    key = jax.random.PRNGKey(0)
    kx, kp = jax.random.split(key)
    x = jax.random.normal(kx, (B, in_features, dim), jnp.float32)
    params = make_params(kp, in_features, out_features, dim)

    out = jax.block_until_ready(dynamic_graph_convolution(x, params))
    assert out.shape == (B, out_features, dim)

    # Tight check vs a reference that mirrors the kernel's bf16 matmul operands
    # (f32 accumulation), plus a looser sanity check vs exact f32 PyTorch math.
    ref_md = jax.block_until_ready(reference_forward(x, params, MATMUL_DTYPE))
    np.testing.assert_allclose(np.asarray(out), np.asarray(ref_md),
                               rtol=2e-2, atol=2e-2)
    ref_f32 = jax.block_until_ready(reference_forward(x, params, jnp.float32))
    np.testing.assert_allclose(np.asarray(out), np.asarray(ref_f32),
                               rtol=6e-2, atol=6e-2)
    print("KERNEL_OK")
</pallas_src>

<mosaic_0001>
module attributes {stable_mosaic.version = 11 : i64} {
  func.func @dgc_kernel(%arg0: i32, %arg1: memref<1x8x32xf32, #tpu.memory_space<vmem>>, %arg2: memref<32x96xbf16, #tpu.memory_space<vmem>>, %arg3: memref<3x96xf32, #tpu.memory_space<vmem>>, %arg4: memref<16x32xbf16, #tpu.memory_space<vmem>>, %arg5: memref<8x8xbf16, #tpu.memory_space<vmem>>, %arg6: memref<1xf32, #tpu.memory_space<smem>>, %arg7: memref<1x1x1x256xf32, #tpu.memory_space<vmem>>) attributes {dimension_semantics = [#tpu.dimension_semantics<parallel>], iteration_bounds = array<i64: 2>, scalar_prefetch = 0 : i64, scratch_operands = 0 : i64, tpu.core_type = #tpu.core_type<tc>, window_params = [{transform_indices = @transform_0, window_bounds = array<i64: 1, 8, 32>}, {pipeline_mode = #tpu.pipeline_mode<synchronous>, transform_indices = @transform_1, window_bounds = array<i64: 32, 96>}, {pipeline_mode = #tpu.pipeline_mode<synchronous>, transform_indices = @transform_2, window_bounds = array<i64: 3, 96>}, {pipeline_mode = #tpu.pipeline_mode<synchronous>, transform_indices = @transform_3, window_bounds = array<i64: 16, 32>}, {pipeline_mode = #tpu.pipeline_mode<synchronous>, transform_indices = @transform_4, window_bounds = array<i64: 8, 8>}, {transform_indices = @transform_5, window_bounds = array<i64: 1>}, {transform_indices = @transform_6, window_bounds = array<i64: 1, 1, 1, 256>}]} {
    %c0 = arith.constant 0 : index
    %c0_0 = arith.constant 0 : index
    %0 = vector.load %arg2[%c0, %c0_0] : memref<32x96xbf16, #tpu.memory_space<vmem>>, vector<32x96xbf16>
    %c0_1 = arith.constant 0 : index
    %c0_2 = arith.constant 0 : index
    %1 = vector.load %arg4[%c0_1, %c0_2] : memref<16x32xbf16, #tpu.memory_space<vmem>>, vector<16x32xbf16>
    %2 = vector.extract_strided_slice %1 {offsets = [0, 0], sizes = [8, 32], strides = [1, 1]} : vector<16x32xbf16> to vector<8x32xbf16>
    %3 = vector.extract_strided_slice %1 {offsets = [8, 0], sizes = [8, 32], strides = [1, 1]} : vector<16x32xbf16> to vector<8x32xbf16>
    %c0_3 = arith.constant 0 : index
    %c0_4 = arith.constant 0 : index
    %4 = vector.load %arg5[%c0_3, %c0_4] : memref<8x8xbf16, #tpu.memory_space<vmem>>, vector<8x8xbf16>
    %c0_5 = arith.constant 0 : index
    %c0_6 = arith.constant 0 : index
    %5 = vector.load %arg3[%c0_5, %c0_6] : memref<3x96xf32, #tpu.memory_space<vmem>>, vector<3x96xf32>
    %6 = vector.extract_strided_slice %5 {offsets = [0, 0], sizes = [1, 96], strides = [1, 1]} : vector<3x96xf32> to vector<1x96xf32>
    %7 = vector.extract_strided_slice %5 {offsets = [1, 0], sizes = [1, 32], strides = [1, 1]} : vector<3x96xf32> to vector<1x32xf32>
    %8 = vector.extract_strided_slice %5 {offsets = [2, 0], sizes = [1, 8], strides = [1, 1]} : vector<3x96xf32> to vector<1x8xf32>
    %c0_7 = arith.constant 0 : index
    %9 = memref.load %arg6[%c0_7] : memref<1xf32, #tpu.memory_space<smem>>
    %c0_8 = arith.constant 0 : index
    %c0_9 = arith.constant 0 : index
    %c0_10 = arith.constant 0 : index
    %10 = vector.load %arg1[%c0_8, %c0_9, %c0_10] : memref<1x8x32xf32, #tpu.memory_space<vmem>>, vector<1x8x32xf32>
    %11 = vector.shape_cast %10 : vector<1x8x32xf32> to vector<8x32xf32>
    %12 = arith.truncf %11 : vector<8x32xf32> to vector<8x32xbf16>
    %cst = arith.constant dense<0.000000e+00> : vector<8x96xf32>
    %13 = tpu.matmul %12, %0, %cst {dimension_numbers = #tpu.dot_dimension_numbers<[1], [0], [0], [1], [0, 0, 1, 1], [], []>} : vector<8x32xbf16>, vector<32x96xbf16>, vector<8x96xf32> -> vector<8x96xf32>
    %14 = vector.broadcast %6 : vector<1x96xf32> to vector<8x96xf32>
    %15 = arith.addf %13, %14 : vector<8x96xf32>
    %16 = vector.extract_strided_slice %15 {offsets = [0, 0], sizes = [8, 32], strides = [1, 1]} : vector<8x96xf32> to vector<8x32xf32>
    %17 = vector.shape_cast %16 : vector<8x32xf32> to vector<1x8x32xf32>
    %18 = vector.extract_strided_slice %15 {offsets = [0, 32], sizes = [8, 32], strides = [1, 1]} : vector<8x96xf32> to vector<8x32xf32>
    %19 = vector.shape_cast %18 : vector<8x32xf32> to vector<1x8x32xf32>
    %20 = vector.extract_strided_slice %15 {offsets = [0, 64], sizes = [8, 32], strides = [1, 1]} : vector<8x96xf32> to vector<8x32xf32>
    %21 = vector.shape_cast %20 : vector<8x32xf32> to vector<1x8x32xf32>
    %22 = arith.truncf %17 : vector<1x8x32xf32> to vector<1x8x32xbf16>
    %23 = arith.truncf %19 : vector<1x8x32xf32> to vector<1x8x32xbf16>
    "tpu.trace_start"() <{level = 10 : i32, message = "bnd,bmd->bnm"}> : () -> ()
    %cst_11 = arith.constant dense<0.000000e+00> : vector<1x8x8xf32>
    %24 = tpu.matmul %22, %23, %cst_11 {dimension_numbers = #tpu.dot_dimension_numbers<[2], [2], [1], [1], [0, 0, 0, 1, 1, 1], [0], [0]>} : vector<1x8x32xbf16>, vector<1x8x32xbf16>, vector<1x8x8xf32> -> vector<1x8x8xf32>
    "tpu.trace_stop"() : () -> ()
    %cst_12 = arith.constant dense<0xFF800000> : vector<1x8xf32>
    %25 = vector.multi_reduction <maximumf>, %24, %cst_12 [2] : vector<1x8x8xf32> to vector<1x8xf32>
    %26 = vector.shape_cast %25 : vector<1x8xf32> to vector<1x8x1xf32>
    %27 = vector.broadcast %26 : vector<1x8x1xf32> to vector<1x8x8xf32>
    %28 = arith.subf %24, %27 : vector<1x8x8xf32>
    %29 = math.exp %28 : vector<1x8x8xf32>
    %cst_13 = arith.constant dense<0.000000e+00> : vector<1x8xf32>
    %30 = vector.multi_reduction <add>, %29, %cst_13 [2] : vector<1x8x8xf32> to vector<1x8xf32>
    %31 = vector.shape_cast %30 : vector<1x8xf32> to vector<1x8x1xf32>
    %32 = tpu.reciprocal %31 {approx = true} : vector<1x8x1xf32> -> vector<1x8x1xf32>
    %33 = vector.broadcast %32 : vector<1x8x1xf32> to vector<1x8x8xf32>
    %34 = arith.mulf %29, %33 : vector<1x8x8xf32>
    %35 = arith.truncf %34 : vector<1x8x8xf32> to vector<1x8x8xbf16>
    %36 = arith.truncf %21 : vector<1x8x32xf32> to vector<1x8x32xbf16>
    "tpu.trace_start"() <{level = 10 : i32, message = "bnm,bmd->bnd"}> : () -> ()
    %cst_14 = arith.constant dense<0.000000e+00> : vector<1x8x32xf32>
    %37 = tpu.matmul %35, %36, %cst_14 {dimension_numbers = #tpu.dot_dimension_numbers<[2], [1], [1], [2], [0, 0, 0, 1, 1, 2], [0], [0]>} : vector<1x8x8xbf16>, vector<1x8x32xbf16>, vector<1x8x32xf32> -> vector<1x8x32xf32>
    "tpu.trace_stop"() : () -> ()
    %38 = vector.broadcast %9 : f32 to vector<1x8x32xf32>
    %39 = arith.mulf %38, %37 : vector<1x8x32xf32>
    %40 = arith.addf %39, %10 : vector<1x8x32xf32>
    %41 = tpu.transpose %40, [0, 2, 1] : vector<1x8x32xf32> -> vector<1x32x8xf32>
    %42 = vector.shape_cast %41 : vector<1x32x8xf32> to vector<32x8xf32>
    %43 = arith.truncf %42 : vector<32x8xf32> to vector<32x8xbf16>
    %44 = tpu.transpose %10, [0, 2, 1] : vector<1x8x32xf32> -> vector<1x32x8xf32>
    %45 = vector.shape_cast %44 : vector<1x32x8xf32> to vector<32x8xf32>
    %46 = arith.truncf %45 : vector<32x8xf32> to vector<32x8xbf16>
    %cst_15 = arith.constant dense<0.000000e+00> : vector<32x32xf32>
    %47 = tpu.matmul %43, %2, %cst_15 {dimension_numbers = #tpu.dot_dimension_numbers<[1], [0], [0], [1], [0, 0, 1, 1], [], []>} : vector<32x8xbf16>, vector<8x32xbf16>, vector<32x32xf32> -> vector<32x32xf32>
    %cst_16 = arith.constant dense<0.000000e+00> : vector<32x32xf32>
    %48 = tpu.matmul %46, %3, %cst_16 {dimension_numbers = #tpu.dot_dimension_numbers<[1], [0], [0], [1], [0, 0, 1, 1], [], []>} : vector<32x8xbf16>, vector<8x32xbf16>, vector<32x32xf32> -> vector<32x32xf32>
    %49 = arith.addf %47, %48 : vector<32x32xf32>
    %50 = vector.broadcast %7 : vector<1x32xf32> to vector<32x32xf32>
    %51 = arith.addf %49, %50 : vector<32x32xf32>
    %52 = arith.negf %51 : vector<32x32xf32>
    %53 = math.exp %52 : vector<32x32xf32>
    %cst_17 = arith.constant 1.000000e+00 : f32
    %54 = vector.broadcast %cst_17 : f32 to vector<32x32xf32>
    %55 = arith.addf %54, %53 : vector<32x32xf32>
    %56 = arith.divf %54, %55 : vector<32x32xf32>
    %57 = vector.shape_cast %56 : vector<32x32xf32> to vector<1x32x32xf32>
    %58 = arith.truncf %10 : vector<1x8x32xf32> to vector<1x8x32xbf16>
    %59 = arith.truncf %57 : vector<1x32x32xf32> to vector<1x32x32xbf16>
    "tpu.trace_start"() <{level = 10 : i32, message = "bne,bde->bnd"}> : () -> ()
    %cst_18 = arith.constant dense<0.000000e+00> : vector<1x8x32xf32>
    %60 = tpu.matmul %58, %59, %cst_18 {dimension_numbers = #tpu.dot_dimension_numbers<[2], [2], [1], [1], [0, 0, 0, 1, 1, 1], [0], [0]>} : vector<1x8x32xbf16>, vector<1x32x32xbf16>, vector<1x8x32xf32> -> vector<1x8x32xf32>
    %cst_19 = arith.constant 0.000000e+00 : f32
    "tpu.trace_stop"() : () -> ()
    %61 = vector.broadcast %cst_19 : f32 to vector<1x8x32xf32>
    %62 = arith.cmpf ogt, %60, %61 : vector<1x8x32xf32>
    %cst_20 = arith.constant 2.000000e-01 : f32
    %63 = vector.broadcast %cst_20 : f32 to vector<1x8x32xf32>
    %64 = arith.mulf %63, %60 : vector<1x8x32xf32>
    %65 = arith.select %62, %60, %64 : vector<1x8x32xi1>, vector<1x8x32xf32>
    %66 = tpu.transpose %65, [0, 2, 1] : vector<1x8x32xf32> -> vector<1x32x8xf32>
    %67 = vector.shape_cast %66 : vector<1x32x8xf32> to vector<32x8xf32>
    %68 = arith.truncf %67 : vector<32x8xf32> to vector<32x8xbf16>
    %cst_21 = arith.constant dense<0.000000e+00> : vector<32x8xf32>
    %69 = tpu.matmul %68, %4, %cst_21 {dimension_numbers = #tpu.dot_dimension_numbers<[1], [0], [0], [1], [0, 0, 1, 1], [], []>} : vector<32x8xbf16>, vector<8x8xbf16>, vector<32x8xf32> -> vector<32x8xf32>
    %70 = vector.broadcast %8 : vector<1x8xf32> to vector<32x8xf32>
    %71 = arith.addf %69, %70 : vector<32x8xf32>
    %cst_22 = arith.constant 0.000000e+00 : f32
    %72 = vector.broadcast %cst_22 : f32 to vector<32x8xf32>
    %73 = arith.cmpf ogt, %71, %72 : vector<32x8xf32>
    %cst_23 = arith.constant 2.000000e-01 : f32
    %74 = vector.broadcast %cst_23 : f32 to vector<32x8xf32>
    %75 = arith.mulf %74, %71 : vector<32x8xf32>
    %76 = arith.select %73, %71, %75 : vector<32x8xi1>, vector<32x8xf32>
    %77 = vector.shape_cast %76 : vector<32x8xf32> to vector<1x32x8xf32>
    %78 = tpu.transpose %77, [0, 2, 1] : vector<1x32x8xf32> -> vector<1x8x32xf32>
    %79 = vector.extract_strided_slice %78 {offsets = [0, 0, 0], sizes = [1, 1, 32], strides = [1, 1, 1]} : vector<1x8x32xf32> to vector<1x1x32xf32>
    %80 = vector.shape_cast %79 : vector<1x1x32xf32> to vector<1x32xf32>
    %c0_24 = arith.constant 0 : index
    %c0_25 = arith.constant 0 : index
    %c0_26 = arith.constant 0 : index
    %c0_27 = arith.constant 0 : index
    %81 = vector.load %arg7[%c0_24, %c0_25, %c0_26, %c0_27] : memref<1x1x1x256xf32, #tpu.memory_space<vmem>>, vector<1x1x1x32xf32>
    %82 = vector.shape_cast %81 : vector<1x1x1x32xf32> to vector<1x32xf32>
    %83 = vector.shape_cast %80 : vector<1x32xf32> to vector<1x1x1x32xf32>
    tpu.vector_store %arg7[%c0_24, %c0_25, %c0_26, %c0_27], %83 {strides = array<i32>} : memref<1x1x1x256xf32, #tpu.memory_space<vmem>>, vector<1x1x1x32xf32>,
    %84 = vector.extract_strided_slice %78 {offsets = [0, 1, 0], sizes = [1, 1, 32], strides = [1, 1, 1]} : vector<1x8x32xf32> to vector<1x1x32xf32>
    %85 = vector.shape_cast %84 : vector<1x1x32xf32> to vector<1x32xf32>
    %c0_28 = arith.constant 0 : index
    %c0_29 = arith.constant 0 : index
    %c0_30 = arith.constant 0 : index
    %c32 = arith.constant 32 : index
    %86 = vector.load %arg7[%c0_28, %c0_29, %c0_30, %c32] : memref<1x1x1x256xf32, #tpu.memory_space<vmem>>, vector<1x1x1x32xf32>
    %87 = vector.shape_cast %86 : vector<1x1x1x32xf32> to vector<1x32xf32>
    %88 = vector.shape_cast %85 : vector<1x32xf32> to vector<1x1x1x32xf32>
    tpu.vector_store %arg7[%c0_28, %c0_29, %c0_30, %c32], %88 {strides = array<i32>} : memref<1x1x1x256xf32, #tpu.memory_space<vmem>>, vector<1x1x1x32xf32>,
    %89 = vector.extract_strided_slice %78 {offsets = [0, 2, 0], sizes = [1, 1, 32], strides = [1, 1, 1]} : vector<1x8x32xf32> to vector<1x1x32xf32>
    %90 = vector.shape_cast %89 : vector<1x1x32xf32> to vector<1x32xf32>
    %c0_31 = arith.constant 0 : index
    %c0_32 = arith.constant 0 : index
    %c0_33 = arith.constant 0 : index
    %c64 = arith.constant 64 : index
    %91 = vector.load %arg7[%c0_31, %c0_32, %c0_33, %c64] : memref<1x1x1x256xf32, #tpu.memory_space<vmem>>, vector<1x1x1x32xf32>
    %92 = vector.shape_cast %91 : vector<1x1x1x32xf32> to vector<1x32xf32>
    %93 = vector.shape_cast %90 : vector<1x32xf32> to vector<1x1x1x32xf32>
    tpu.vector_store %arg7[%c0_31, %c0_32, %c0_33, %c64], %93 {strides = array<i32>} : memref<1x1x1x256xf32, #tpu.memory_space<vmem>>, vector<1x1x1x32xf32>,
    %94 = vector.extract_strided_slice %78 {offsets = [0, 3, 0], sizes = [1, 1, 32], strides = [1, 1, 1]} : vector<1x8x32xf32> to vector<1x1x32xf32>
    %95 = vector.shape_cast %94 : vector<1x1x32xf32> to vector<1x32xf32>
    %c0_34 = arith.constant 0 : index
    %c0_35 = arith.constant 0 : index
    %c0_36 = arith.constant 0 : index
    %c96 = arith.constant 96 : index
    %96 = vector.load %arg7[%c0_34, %c0_35, %c0_36, %c96] : memref<1x1x1x256xf32, #tpu.memory_space<vmem>>, vector<1x1x1x32xf32>
    %97 = vector.shape_cast %96 : vector<1x1x1x32xf32> to vector<1x32xf32>
    %98 = vector.shape_cast %95 : vector<1x32xf32> to vector<1x1x1x32xf32>
    tpu.vector_store %arg7[%c0_34, %c0_35, %c0_36, %c96], %98 {strides = array<i32>} : memref<1x1x1x256xf32, #tpu.memory_space<vmem>>, vector<1x1x1x32xf32>,
    %99 = vector.extract_strided_slice %78 {offsets = [0, 4, 0], sizes = [1, 1, 32], strides = [1, 1, 1]} : vector<1x8x32xf32> to vector<1x1x32xf32>
    %100 = vector.shape_cast %99 : vector<1x1x32xf32> to vector<1x32xf32>
    %c0_37 = arith.constant 0 : index
    %c0_38 = arith.constant 0 : index
    %c0_39 = arith.constant 0 : index
    %c128 = arith.constant 128 : index
    %101 = vector.load %arg7[%c0_37, %c0_38, %c0_39, %c128] : memref<1x1x1x256xf32, #tpu.memory_space<vmem>>, vector<1x1x1x32xf32>
    %102 = vector.shape_cast %101 : vector<1x1x1x32xf32> to vector<1x32xf32>
    %103 = vector.shape_cast %100 : vector<1x32xf32> to vector<1x1x1x32xf32>
    tpu.vector_store %arg7[%c0_37, %c0_38, %c0_39, %c128], %103 {strides = array<i32>} : memref<1x1x1x256xf32, #tpu.memory_space<vmem>>, vector<1x1x1x32xf32>,
    %104 = vector.extract_strided_slice %78 {offsets = [0, 5, 0], sizes = [1, 1, 32], strides = [1, 1, 1]} : vector<1x8x32xf32> to vector<1x1x32xf32>
    %105 = vector.shape_cast %104 : vector<1x1x32xf32> to vector<1x32xf32>
    %c0_40 = arith.constant 0 : index
    %c0_41 = arith.constant 0 : index
    %c0_42 = arith.constant 0 : index
    %c160 = arith.constant 160 : index
    %106 = vector.load %arg7[%c0_40, %c0_41, %c0_42, %c160] : memref<1x1x1x256xf32, #tpu.memory_space<vmem>>, vector<1x1x1x32xf32>
    %107 = vector.shape_cast %106 : vector<1x1x1x32xf32> to vector<1x32xf32>
    %108 = vector.shape_cast %105 : vector<1x32xf32> to vector<1x1x1x32xf32>
    tpu.vector_store %arg7[%c0_40, %c0_41, %c0_42, %c160], %108 {strides = array<i32>} : memref<1x1x1x256xf32, #tpu.memory_space<vmem>>, vector<1x1x1x32xf32>,
    %109 = vector.extract_strided_slice %78 {offsets = [0, 6, 0], sizes = [1, 1, 32], strides = [1, 1, 1]} : vector<1x8x32xf32> to vector<1x1x32xf32>
    %110 = vector.shape_cast %109 : vector<1x1x32xf32> to vector<1x32xf32>
    %c0_43 = arith.constant 0 : index
    %c0_44 = arith.constant 0 : index
    %c0_45 = arith.constant 0 : index
    %c192 = arith.constant 192 : index
    %111 = vector.load %arg7[%c0_43, %c0_44, %c0_45, %c192] : memref<1x1x1x256xf32, #tpu.memory_space<vmem>>, vector<1x1x1x32xf32>
    %112 = vector.shape_cast %111 : vector<1x1x1x32xf32> to vector<1x32xf32>
    %113 = vector.shape_cast %110 : vector<1x32xf32> to vector<1x1x1x32xf32>
    tpu.vector_store %arg7[%c0_43, %c0_44, %c0_45, %c192], %113 {strides = array<i32>} : memref<1x1x1x256xf32, #tpu.memory_space<vmem>>, vector<1x1x1x32xf32>,
    %114 = vector.extract_strided_slice %78 {offsets = [0, 7, 0], sizes = [1, 1, 32], strides = [1, 1, 1]} : vector<1x8x32xf32> to vector<1x1x32xf32>
    %115 = vector.shape_cast %114 : vector<1x1x32xf32> to vector<1x32xf32>
    %c0_46 = arith.constant 0 : index
    %c0_47 = arith.constant 0 : index
    %c0_48 = arith.constant 0 : index
    %c224 = arith.constant 224 : index
    %116 = vector.load %arg7[%c0_46, %c0_47, %c0_48, %c224] : memref<1x1x1x256xf32, #tpu.memory_space<vmem>>, vector<1x1x1x32xf32>
    %117 = vector.shape_cast %116 : vector<1x1x1x32xf32> to vector<1x32xf32>
    %118 = vector.shape_cast %115 : vector<1x32xf32> to vector<1x1x1x32xf32>
    tpu.vector_store %arg7[%c0_46, %c0_47, %c0_48, %c224], %118 {strides = array<i32>} : memref<1x1x1x256xf32, #tpu.memory_space<vmem>>, vector<1x1x1x32xf32>,
    return
  }
  func.func @transform_0(%arg0: i32) -> (i32, i32, i32) {
    %c0_i32 = arith.constant 0 : i32
    %c0_i32_0 = arith.constant 0 : i32
    %c0_i32_1 = arith.constant 0 : i32
    return %arg0, %c0_i32, %c0_i32_0 : i32, i32, i32
  }
  func.func @transform_1(%arg0: i32) -> (i32, i32) {
    %c0_i32 = arith.constant 0 : i32
    %c0_i32_0 = arith.constant 0 : i32
    %c0_i32_1 = arith.constant 0 : i32
    return %c0_i32, %c0_i32_0 : i32, i32
  }
  func.func @transform_2(%arg0: i32) -> (i32, i32) {
    %c0_i32 = arith.constant 0 : i32
    %c0_i32_0 = arith.constant 0 : i32
    %c0_i32_1 = arith.constant 0 : i32
    return %c0_i32, %c0_i32_0 : i32, i32
  }
  func.func @transform_3(%arg0: i32) -> (i32, i32) {
    %c0_i32 = arith.constant 0 : i32
    %c0_i32_0 = arith.constant 0 : i32
    %c0_i32_1 = arith.constant 0 : i32
    return %c0_i32, %c0_i32_0 : i32, i32
  }
  func.func @transform_4(%arg0: i32) -> (i32, i32) {
    %c0_i32 = arith.constant 0 : i32
    %c0_i32_0 = arith.constant 0 : i32
    %c0_i32_1 = arith.constant 0 : i32
    return %c0_i32, %c0_i32_0 : i32, i32
  }
  func.func @transform_5(%arg0: i32) -> i32 {
    %c0_i32 = arith.constant 0 : i32
    %c0_i32_0 = arith.constant 0 : i32
    return %c0_i32 : i32
  }
  func.func @transform_6(%arg0: i32) -> (i32, i32, i32, i32) {
    %c0_i32 = arith.constant 0 : i32
    %c0_i32_0 = arith.constant 0 : i32
    %c0_i32_1 = arith.constant 0 : i32
    %c0_i32_2 = arith.constant 0 : i32
    return %arg0, %c0_i32, %c0_i32_0, %c0_i32_1 : i32, i32, i32, i32
  }
}

</mosaic_0001>

<bundles_post_ra>
// kernel: tpu_custom_call.1
= control target key start
LH: loop header
LB: loop body
LE: loop exit
PB: predicated region body
PF: predicated region fallthrough
CT: control target
= control target key end

     0   :  { %s1749_s0 = inlined_call_operand.hbm [shape: f32[2,8,32], index: 0, kind: input, shape index: {}]   ;;  %s1750_s1 = inlined_call_operand.hbm [shape: bf16[32,96], index: 1, kind: input, shape index: {}]   ;;  %s1751_s2 = inlined_call_operand.vmem [shape: f32[3,96], index: 2, kind: input, shape index: {}]   ;;  %s1752_s3 = inlined_call_operand.vmem [shape: bf16[16,32], index: 3, kind: input, shape index: {}]   ;;  %s1753_s4 = inlined_call_operand.vmem [shape: bf16[8,8], index: 4, kind: input, shape index: {}]   ;;  %s1754_s5 = inlined_call_operand.<no memory space> [shape: f32[1], index: 5, kind: input, shape index: {}]   ;;  %s1755_s6 = inlined_call_operand.hbm [shape: f32[2,1,1,256], index: 6, kind: output, shape index: {}]  }
   0x1   :  { %11 = sst [smem:[#allocation2]] %s1754_s5 }
   0x2   :  { %12 = vsyncpa [#allocation4], 0 }
   0x3   :  { %14 = vsyncpa [#allocation4 + $0x1], 0 }
   0x4   :  { %15 = vsyncpa [#allocation7], 0 }
   0x5   :  { %16 = vsyncpa [#allocation5], 0 }
   0x6   :  { %18 = vsyncpa [#allocation5 + $0x1], 0  ;;  %s1432_s23 = smov 0   ;;  %s1434_s24 = smov 0  }
   0x7   :  { %s1436_s25 = smov 0   ;;  %s1438_s26 = smov 0  }
   0x8 LB: > { %s1453_s5 = sadd.s32 4294967295, %s1381_s26   ;;  %s1062_s27 = sadd.s32 4294967294, %s1381_s26   ;;  %s1381_s26 = sphi %s1438_s26, %s1783_s26   ;;  %s1377_s25 = sphi %s1436_s25, %s1782_s25   ;;  %s1373_s24 = sphi %s1434_s24, %s1781_s24   ;;  %s1369_s23 = sphi %s1432_s23, %s1780_s23  }
   0x9   : > { %p44_p0 = scmp.ne.s32.totalorder %s1373_s24, %s1369_s23  ;;  %p1756_p1 = scmp.eq.s32.totalorder %s1453_s5, 0 }
   0xa   : > { %p179_p3 = scmp.eq.s32.totalorder %s1062_s27, 1  ;;  %p1063_p5 = scmp.ge.s32.totalorder %s1381_s26, 1 }
   0xb   : > { %p1462_p4 = por %p1756_p1, %p44_p0  ;;  %p186_p7 = scmp.lt.s32.totalorder %s1381_s26, 3 }
   0xc   : > { %p1467_p6 = por %p179_p3, %p44_p0  ;;  %s1383_s7 = smov [#allocation6]  }
   0xd   : > { %s1759_s28 = scalar_select %p1462_p4, 1, 0 }
   0xe   : > { %s1760_s29 = scalar_select %p1467_p6, 1, 0 }
   0xf   : > { %p1472_p8 = pnand %p1063_p5, %p186_p7  ;;  %s198_s8 = sshll.u32 %s1383_s7, 4  ;;  %s1476_s8 = int_to_ptr.vmem [resolvable:$true] %s198_s8 }
  0x10   : > { %s1488_s10 = sadd.s32 1, %s1381_s26   ;;  %s31_s11 = sadd.s32 1, %s1377_s25 }
  0x11   : > { %s1761_s30 = scalar_select %p1472_p8, 1, 0 }
  0x12   : > { %p1174_p9 = pneg %p1472_p8  ;;  %s28_s12 = ssub.s32 %s1381_s26, %s1488_s10 }
  0x13   : > { %s1253_s15 = scalar_lea.hbm %s1750_s1, 256 }
  0x14   : > { %p1483_p11 = pnand %p1174_p9, %p1756_p1  ;;  %p1254_p12 = scmp.ne.s32.totalorder %s1750_s1, %s1253_s15 }
  0x15   : > { %p1260_p5 = scmp.lt.u32.totalorder %s1253_s15, %s1750_s1 }
  0x16   : > { %p1255_p13 = pneg %p1483_p11 }
  0x18   : > { %p1256_p0 = pnand %p1255_p13, %p1254_p12 }
  0x1a   : > { %p1257_p3 = pneg %p1256_p0 }
  0x1c   : > { %p1262_p7 = pnand %p1260_p5, %p1257_p3 }
  0x1e   : > { %1265 = shalt.err (!%p1262_p7)
}
  0x1f   : > { %s1266_s20 = scalar_lea.vmem %s1476_s8, 256  ;;  %p1274_p2 = scmp.lt.s32.totalorder %s1476_s8, %s1476_s8 }
  0x20   : > { %p1267_p9 = scmp.ne.s32.totalorder %s1476_s8, %s1266_s20  ;;  %p1275_p6 = scmp.lt.s32.totalorder %s1266_s20, %s1266_s20 }
  0x22   : > { %p1269_p10 = pnand %p1267_p9, %p1255_p13  ;;  %p1276_p4 = por %p1275_p6, %p1274_p2 }
  0x24   : > { %p1270_p1 = pneg %p1269_p10 }
  0x26   : > { %p1277_p8 = pnand %p1276_p4, %p1270_p1 }
  0x28   : > { %1280 = shalt.err (!%p1277_p8)
}
  0x29   : > { %s1384_s21 = smov 64   ;;  %s1385_s22 = smov 4  }
  0x2a   : > { %1177 = dma.hbm_to_vmem [thread:$0]  (!%p1483_p11), %s1750_s1, 256, %s1476_s8, [#allocation7], %s1384_s21, %s1384_s21, %s1385_s22  }
  0x2b   : > { %p29_p2 = scmp.eq.s32.totalorder %s28_s12, 0  ;;  %p38_p1 = scmp.ne.s32.totalorder %s1377_s25, %s1373_s24 }
  0x2c   : > { %p39_p4 = scmp.eq.s32.totalorder %s1381_s26, 0  ;;  %p1187_p6 = scmp.lt.s32.totalorder %s1381_s26, 2 }
  0x2d   : > { %s1519_s13 = scalar_select %p29_p2, %s1377_s25, %s31_s11  }
  0x2e   : > { %p40_p8 = por %p39_p4, %p38_p1  ;;  %p1763_p10 = scmp.eq.s32.totalorder %s1453_s5, 1 }
  0x2f   : > { %s224_s15 = sand.u32 1, %s1377_s25   ;;  %s1067_s16 = sshll.u32 %s1381_s26, 7 }
  0x30   : > { %p1523_p12 = por %p1763_p10, %p38_p1  ;;  %s1066_s17 = sshll.u32 %s224_s15, 3 }
  0x31   : > { %s1532_s19 = scalar_lea.hbm %s1749_s0, %s1067_s16  ;;  %s228_s8 = scalar_lea.vmem [#allocation3], %s1066_s17 }
  0x32   : > { %s235_s11 = sshll.u32 %s228_s8, 4  ;;  %p1534_p11 = pnand %p1187_p6, %p40_p8  ;;  %s1538_s11 = int_to_ptr.vmem [resolvable:$true] %s235_s11 }
  0x33   : > { %s225_s20 = scalar_lea.sflag [#allocation4], %s224_s15  ;;  %s1281_s21 = scalar_lea.hbm %s1532_s19, 128 }
  0x34   : > { %p1282_p13 = scmp.ne.s32.totalorder %s1532_s19, %s1281_s21  ;;  %p1283_p0 = pneg %p1534_p11 }
  0x35   : > { %s1286_s7 = scalar_lea.hbm %s1749_s0, 256  ;;  %p1287_p7 = scmp.lt.u32.totalorder %s1532_s19, %s1749_s0 }
  0x36   : > { %p1284_p3 = pnand %p1283_p0, %p1282_p13  ;;  %p1288_p9 = scmp.lt.u32.totalorder %s1286_s7, %s1281_s21 }
  0x37   : > { %p1290_p1 = scmp.lt.u32.totalorder %s1281_s21, %s1532_s19 }
  0x38   : > { %p1285_p5 = pneg %p1284_p3  ;;  %p1289_p2 = por %p1288_p9, %p1287_p7 }
  0x3a   : > { %p1291_p4 = por %p1290_p1, %p1289_p2 }
  0x3c   : > { %p1292_p6 = pnand %p1291_p4, %p1285_p5 }
  0x3e   : > { %1295 = shalt.err (!%p1292_p6)
}
  0x3f   : > { %s1296_s15 = scalar_lea.vmem %s1538_s11, 128  ;;  %s1386_s9 = smov [#allocation3]  }
  0x40   : > { %p1297_p8 = scmp.ne.s32.totalorder %s1538_s11, %s1296_s15  ;;  %s1301_s18 = sshll.u32 %s1386_s9, 4  ;;  %s1302_s18 = int_to_ptr.vmem [resolvable:$false] %s1301_s18 }
  0x41   : > { %s1303_s8 = scalar_lea.vmem %s1302_s18, 256  ;;  %p1304_p3 = scmp.lt.s32.totalorder %s1538_s11, %s1302_s18 }
  0x42   : > { %p1299_p10 = pnand %p1297_p8, %p1283_p0  ;;  %p1305_p7 = scmp.lt.s32.totalorder %s1303_s8, %s1296_s15 }
  0x44   : > { %p1300_p13 = pneg %p1299_p10  ;;  %p1306_p9 = por %p1305_p7, %p1304_p3 }
  0x46   : > { %p1307_p2 = pnand %p1306_p9, %p1300_p13 }
  0x48   : > { %1310 = shalt.err (!%p1307_p2)
}
  0x49   : > { %1181 = dma.hbm_to_vmem [thread:$0]  (!%p1534_p11), %s1532_s19, 128, %s1538_s11, %s225_s20  }
  0x4a   : > { %p1766_p5 = scmp.ne.s32.totalorder %s1761_s30, 0 }
  0x4b   : > { %s1568_s21 = sand.u32 (!%p1766_p5), 1, %s1373_s24   ;;  %p1767_p0 = scmp.ne.s32.totalorder (!%p1766_p5), %s1759_s28, 0 }
  0x4c   : > { %244 = sbr.rel (%p1766_p5) target bundleno = 2432 (0x980), region = 44  ;;  %s1069_s22 = sshll.u32 (!%p1766_p5), %s1568_s21, 3 }
  0x4d   : > { %s247_s27 = scalar_lea.sflag (!%p1766_p5), [#allocation4], %s1568_s21  ;;  %s250_s7 = scalar_lea.vmem (!%p1766_p5), [#allocation3], %s1069_s22 }
  0x53   : > { %1356 = dma.done.wait (%p1767_p0), %s247_s27, 128  }
  0x54   : > { %1358 = vsyncadd (%p1767_p0), %s247_s27, 4294967168  ;;  %p1768_p1 = scmp.eq.s32.totalorder %s1453_s5, 0 }
  0x56   : > { %1360 = dma.done.wait (%p1768_p1), [#allocation7], 256   ;;  %p1769_p11 = pmov %p1768_p1 }
  0x57   : > { %v1387_v0 = vmov 0.0   ;;  %vm1388_vm0 = vmmov 0   ;;  %v1231_v1 = vld [vmem:[#allocation6] sm:$0xff]   ;;  %v1232_v2 = vld [vmem:[#allocation6 + $0x8] sm:$0xff]   ;;  %v1586_v3 = vld [vmem:[%s250_s7] sm:$0xff]  ;;  %vm311_vm1 = vcmask 261120   ;;  %v295_v5 = vlaneseq }
  0x58   : > { %1362 = vsyncadd (%p1769_p11), [#allocation7], 4294967040  ;;  %1113 = vmatprep.subr.bf16.mxu0 %v1387_v0  ;;  %1117 = vmatprep.mubr.msk.bf16.mxu0 %vm1388_vm0, %v1387_v0  ;;  %v1591_v4 = vpack.c.bf16 %v1586_v3, %v1586_v3  ;;  %v1605_v8 = vld [vmem:[%s1751_s2] sm:$0x7]  ;;  %s1389_s19 = smov 96   ;;  %vm405_vm2 = vcmask 64512  }
  0x59   : > { %1121 = vmatprep.subr.bf16.mxu1 %v1387_v0  ;;  %1123 = vmatprep.mubr.msk.bf16.mxu1 %vm1388_vm0, %v1387_v0  ;;  %v1599_v6 = vshrl.u32 %v295_v5, 7  ;;  %s1390_s11 = smov 64   ;;  %vm423_vm3 = vcmask 1043456   ;;  %v289_v35 = vld [vmem:[%s1752_s3 + $0x4] sm:$0xf]  ;;  %s292_s16 = sld [smem:[#allocation2]] }
  0x5a   : > { %1114 = vmatpush3.bf16.msra.mxu0 %v1231_v1  ;;  %v545_v36 = vsel %vm423_vm3, %v289_v35, 0  ;;  %v288_v49 = vld [vmem:[%s1752_s3] sm:$0xf]  ;;  %s1071_s8 = sshll.u32 %s1568_s21, 1  ;;  %vm1654_vm9 = vcmp.lt.s32.totalorder %v295_v5, 32  ;;  %s1392_s27 = smov 32  }
  0x5b   : > { %1115 = vmatprep.subr.bf16.mxu0 %v1387_v0  ;;  %v297_v7 = vsub.s32 0, %v1599_v6  ;;  %v603_v50 = vsel %vm423_vm3, %v288_v49, 0  ;;  %v656_v57 = vsub.s32 1, %v1599_v6  ;;  %s1658_s22 = scalar_lea.vmem [#allocation8], %s1071_s8  ;;  %vm1671_vm10 = vcmp.ge.s32.totalorder %v295_v5, 32  ;;  %s1093_s7 = sshll.u32 %s1453_s5, 5 }
  0x5c   : > { %vm1676_vm11 = vcmp.lt.s32.totalorder %v295_v5, 64  ;;  %vm1681_vm12 = vcmp.ge.s32.totalorder %v295_v5, 64  ;;  %vm917_vm13 = vcmp.lt.s32.totalorder %v295_v5, 96  ;;  %s982_s28 = sshll.u32 %s1658_s22, 4  ;;  %s968_s12 = scalar_lea.sflag [#allocation5], %s1568_s21  ;;  %s1705_s28 = int_to_ptr.vmem [resolvable:$true] %s982_s28 }
  0x5d   : > { %v298_v9 = vrot.slane %v1605_v8, %v297_v7  ;;  %v657_v58 = vrot.slane %v1605_v8, %v656_v57  ;;  %v1391_v57 = vmov 1966171168   ;;  %vm910_vm14 = vmand %vm1671_vm10, %vm1676_vm11  ;;  %s1311_s5 = scalar_lea.vmem %s1705_s28, 32  ;;  %s1393_s20 = smov [#allocation8]  }
  0x5e   : > { %1116 = vmatpush3.bf16.msra.mxu0 %v1232_v2  ;;  %vm918_vm15 = vmand %vm1681_vm12, %vm917_vm13  ;;  %p1312_p4 = scmp.ne.s32.totalorder %s1705_s28, %s1311_s5 }
  0x5f   : > { %1127 = vmatprep.subr.bf16.mxu0 %v1387_v0  ;;  %v467_v42 = vstv %s292_s16  ;;  %s1315_s16 = sshll.u32 %s1393_s20, 4  ;;  %s1316_s16 = int_to_ptr.vmem [resolvable:$false] %s1315_s16 }
  0x60   : > { %p1313_p6 = pnand %p1312_p4, %p1523_p12  ;;  %s1317_s17 = scalar_lea.vmem %s1316_s16, 64 }
  0x61   : > { %1118 = vmatmul.mubr.msk.bf16.vlgmr.msra.gmra.mrb[0].mxu0 %vm311_vm1, %v1591_v4  ;;  %p1318_p10 = scmp.lt.s32.totalorder %s1705_s28, %s1316_s16  ;;  %p1319_p13 = scmp.lt.s32.totalorder %s1317_s17, %s1311_s5 }
  0x62   : > { %1129 = vmatprep.mubr.msk.bf16.mxu0 %vm1388_vm0, %v1387_v0  ;;  %p1314_p8 = pneg %p1313_p6 }
  0x63   : > { %p1320_p3 = por %p1319_p13, %p1318_p10 }
  0x65   : > { %p1321_p7 = pnand %p1320_p3, %p1314_p8 }
 0x134   : > { %v349_v10 = vpop.f32.mrb[0].mxu0 }
 0x135   : > { %v350_v11 = vadd.f32 %v349_v10, %v298_v9  ;;  %v1119_v12 = vpop.f32.mrb[1].mxu0 }
 0x136   : > { %v352_v13 = vpop.f32.mrb[2].mxu0 }
 0x137   : > { %v355_v14 = vpack.c.bf16 %v350_v11, %v350_v11  ;;  %v1120_v15 = vpop.f32.mrb[3].mxu0 }
 0x139   : > { %357 = vrot.lane.b32.xlu0 %v355_v14, %s1389_s19 }
 0x1ab   : > { %v358_v16 = vpop.permute.xlu0 %357 }
 0x1ac   : > { %v363_v17 = vsel %vm311_vm1, %v358_v16, 0 }
 0x1ad   : > { %1122 = vmatpush3.bf16.xpose.msra.mxu1 %v363_v17 }
 0x1ae   : > { %1163 = vmatprep.subr.msk.bf16.mxu1 %vm423_vm3, %v289_v35 }
 0x1b4   : > { %1124 = vmatmul.mubr.msk.bf16.vlgmr.msra.gmra.mrb[0].mxu1 %vm311_vm1, %v355_v14 }
 0x1b5   : > { %1134 = vmatpush3.bf16.msra.mxu1 %v545_v36 }
 0x1b6   : > { %1164 = vmatprep.subr.msk.bf16.mxu1 %vm423_vm3, %v288_v49 }
 0x287   : > { %v399_v18 = vpop.f32.mrb[0].mxu1 }
 0x288   : > { %v1125_v19 = vpop.f32.mrb[1].mxu1  ;;  %v406_v20 = vsel %vm405_vm2, %v399_v18, -inf }
 0x289   : > { %407 = vmax.xlane.f32.xlu0 %v406_v20  ;;  %v402_v21 = vpop.f32.mrb[2].mxu1 }
 0x28a   : > { %v1126_v22 = vpop.f32.mrb[3].mxu1 }
 0x316   : > { %v408_v23 = vpop.xlane.xlu0 %407 }
 0x317   : > { %v409_v24 = vsub.f32 %v399_v18, %v408_v23 }
 0x319   : > { %v410_v25 = vmul.f32 1.442695, %v409_v24 }
 0x31b   : > { %1233 = vpow2.f32 %v410_v25 }
 0x325   : > { %v1234_v26 = vpop.eup %1233 }
 0x326   : > { %v412_v27 = vsel %vm405_vm2, %v1234_v26, 0.0 }
 0x327   : > { %413 = vadd.xlane.f32.xlu1 %v412_v27 }
 0x338   : > { %418 = vrot.lane.b32.xlu1 %v355_v14, %s1390_s11 }
 0x361   : > { %504 = vxpose.xlu1.b32.start.end [1/1] (short) (narrow) %v1586_v3, 32 }
 0x3b4   : > { %v414_v28 = vpop.xlane.xlu1 %413 }
 0x3b5   : > { %1235 = vrcp.f32 %v414_v28 }
 0x3b8   : > { %v419_v29 = vpop.permute.xlu1 %418 }
 0x3b9   : > { %v425_v30 = vsel %vm423_vm3, %v419_v29, 0 }
 0x3ba   : > { %1128 = vmatpush3.bf16.msra.mxu0 %v425_v30 }
 0x3bb   : > { %1145 = vmatprep.subr.bf16.mxu0 %v1387_v0 }
 0x3bf   : > { %v1236_v31 = vpop.eup %1235 }
 0x3c0   : > { %v416_v32 = vmul.f32 %v1236_v31, %v1234_v26 }
 0x3c2   : > { %v417_v33 = vpack.c.bf16 %v416_v32, %v416_v32 }
 0x3c4   : > { %1130 = vmatmul.mubr.msk.bf16.vlgmr.msra.gmra.mrb[4].mxu0 %vm405_vm2, %v417_v33 }
 0x3c5   : > { %1149 = vmatprep.mubr.msk.bf16.mxu0 %vm1388_vm0, %v1387_v0  ;;  %vm924_vm0 = vcmp.ge.s32.totalorder %v295_v5, 96 }
 0x3e1   : > { %v520_v34 = vpop.trf.xlu1 }
 0x3e5   : > { %v521_v37 = vpop.trf.xlu1 }
 0x3e6   : > { %v536_v38 = vpack.c.bf16 %v521_v37, %v520_v34  ;;  %v290_v34 = vld [vmem:[%s1753_s4] sm:$0xf] }
 0x3e8   : > { %1135 = vmatprep.mubr.msk.bf16.mxu1 %vm405_vm2, %v536_v38 }
 0x3e9   : > { %v522_v39 = vpop.trf.xlu1 }
 0x3ed   : > { %v523_v40 = vpop.trf.xlu1 }
 0x3ee   : > { %v537_v41 = vpack.c.bf16 %v523_v40, %v522_v39  ;;  %v773_v40 = vsub.s32 2, %v1599_v6 }
 0x3f0   : > { %1136 = vmatmul.mubr.msk.bf16.vlgmr.msra.gmra.mrb[4].mxu1 %vm405_vm2, %v537_v41  ;;  %v774_v41 = vrot.slane %v1605_v8, %v773_v40 }
 0x3f1   : > { %1140 = vmatpush3.bf16.msra.mxu1 %v603_v50 }
 0x3f2   : > { %1165 = vmatprep.subr.msk.bf16.mxu1 %vm423_vm3, %v290_v34 }
 0x497   : > { %v461_v43 = vpop.f32.mrb[4].mxu0 }
 0x498   : > { %v468_v44 = vmul.f32 %v467_v42, %v461_v43  ;;  %v1131_v45 = vpop.f32.mrb[5].mxu0 }
 0x499   : > { %v464_v46 = vpop.f32.mrb[6].mxu0 }
 0x49a   : > { %v1132_v47 = vpop.f32.mrb[7].mxu0  ;;  %v469_v48 = vadd.f32 %v468_v44, %v1586_v3 }
 0x49c   : > { %470 = vxpose.xlu0.b32.start.end [1/1] (short) (narrow) %v469_v48, 32 }
 0x51c   : > { %v486_v51 = vpop.trf.xlu0 }
 0x520   : > { %v487_v52 = vpop.trf.xlu0 }
 0x521   : > { %v502_v53 = vpack.c.bf16 %v487_v52, %v486_v51 }
 0x523   : > { %1141 = vmatprep.mubr.msk.bf16.mxu1 %vm405_vm2, %v502_v53 }
 0x524   : > { %v488_v54 = vpop.trf.xlu0 }
 0x528   : > { %v489_v55 = vpop.trf.xlu0 }
 0x529   : > { %v503_v56 = vpack.c.bf16 %v489_v55, %v488_v54 }
 0x52b   : > { %1142 = vmatmul.mubr.msk.bf16.vlgmr.msra.gmra.mrb[4].mxu1 %vm405_vm2, %v503_v56 }
 0x5fe   : > { %v1143_v59 = vpop.f32.mrb[4].mxu1 }
 0x5ff   : > { %v660_v60 = vadd.f32 %v1143_v59, %v657_v58  ;;  %v639_v61 = vpop.f32.mrb[5].mxu1 }
 0x600   : > { %v658_v62 = vadd.f32 %v657_v58, %v639_v61  ;;  %v1144_v63 = vpop.f32.mrb[6].mxu1 }
 0x601   : > { %v1083_v1 = vmul.f32 -1.442695, %v660_v60  ;;  %v661_v2 = vadd.f32 %v1144_v63, %v657_v58  ;;  %v642_v3 = vpop.f32.mrb[7].mxu1 }
 0x602   : > { %v1081_v7 = vmul.f32 -1.442695, %v658_v62  ;;  %v659_v9 = vadd.f32 %v657_v58, %v642_v3  ;;  %v884_v58 = vunpack.c.l.s4 %v1391_v57 }
 0x603   : > { %1237 = vpow2.f32 %v1083_v1  ;;  %v1084_v10 = vmul.f32 -1.442695, %v661_v2 }
 0x604   : > { %1239 = vpow2.f32 %v1081_v7  ;;  %v1082_v11 = vmul.f32 -1.442695, %v659_v9  ;;  %v885_v59 = vunpack.c.0.s8 %v884_v58 }
 0x605   : > { %1241 = vpow2.f32 %v1084_v10 }
 0x606   : > { %1243 = vpow2.f32 %v1082_v11  ;;  %v888_v60 = vsub.s32 %v885_v59, %v1599_v6 }
 0x60d   : > { %v1238_v12 = vpop.eup %1237 }
 0x60e   : > { %v1240_v13 = vpop.eup %1239  ;;  %v676_v14 = vadd.f32 1.0, %v1238_v12 }
 0x60f   : > { %v1242_v15 = vpop.eup %1241  ;;  %v674_v16 = vadd.f32 1.0, %v1240_v13 }
 0x610   : > { %v1244_v17 = vpop.eup %1243  ;;  %1245 = vrcp.f32 %v676_v14  ;;  %v677_v18 = vadd.f32 1.0, %v1242_v15 }
 0x611   : > { %1247 = vrcp.f32 %v674_v16  ;;  %v675_v19 = vadd.f32 1.0, %v1244_v17 }
 0x612   : > { %1249 = vrcp.f32 %v677_v18 }
 0x613   : > { %1251 = vrcp.f32 %v675_v19 }
 0x61a   : > { %v1246_v20 = vpop.eup %1245 }
 0x61b   : > { %v1248_v21 = vpop.eup %1247 }
 0x61c   : > { %v1250_v22 = vpop.eup %1249 }
 0x61d   : > { %v1252_v23 = vpop.eup %1251  ;;  %v687_v24 = vpack.c.bf16 %v1250_v22, %v1246_v20 }
 0x61e   : > { %v686_v25 = vpack.c.bf16 %v1252_v23, %v1248_v21 }
 0x61f   : > { %v692_v27 = vsel %vm311_vm1, %v687_v24, 0 }
 0x620   : > { %v689_v26 = vsel %vm311_vm1, %v686_v25, 0 }
 0x621   : > { %1146 = vmatpush3.bf16.xpose.msra.mxu0 %v689_v26 }
 0x622   : > { %1147 = vmatprep.subr.bf16.mxu0 %v1387_v0  ;;  %v782_v0 = vsel %vm423_vm3, %v290_v34, 0 }
 0x623   : > { %1154 = vmatpush3.bf16.msra.mxu1 %v782_v0 }
 0x629   : > { %1148 = vmatpush3.bf16.xpose.msra.mxu0 %v692_v27 }
 0x630   : > { %1150 = vmatmul.mubr.msk.bf16.vlgmr.msra.gmra.mrb[8].mxu0 %vm311_vm1, %v1591_v4  ;;  %vm925_vm1 = vcmp.lt.s32.totalorder %v295_v5, 128 }
 0x703   : > { %v728_v28 = vpop.f32.mrb[8].mxu0 }
 0x704   : > { %v735_v29 = vmul.f32 0.2, %v728_v28  ;;  %v1151_v30 = vpop.f32.mrb[9].mxu0  ;;  %vm734_vm4 = vcmp.gt.f32.partialorder %v728_v28, 0.0 }
 0x705   : > { %v731_v31 = vpop.f32.mrb[10].mxu0 }
 0x706   : > { %v1152_v32 = vpop.f32.mrb[11].mxu0  ;;  %v736_v33 = vsel %vm734_vm4, %v728_v28, %v735_v29 }
 0x707   : > { %737 = vxpose.xlu1.b32.start.end [1/1] (short) (narrow) %v736_v33, 32 }
 0x787   : > { %v753_v35 = vpop.trf.xlu1 }
 0x78b   : > { %v754_v36 = vpop.trf.xlu1 }
 0x78c   : > { %v769_v4 = vpack.c.bf16 %v754_v36, %v753_v35 }
 0x78e   : > { %1155 = vmatprep.mubr.msk.bf16.mxu1 %vm405_vm2, %v769_v4 }
 0x78f   : > { %v755_v37 = vpop.trf.xlu1 }
 0x793   : > { %v756_v38 = vpop.trf.xlu1 }
 0x794   : > { %v770_v39 = vpack.c.bf16 %v756_v38, %v755_v37 }
 0x796   : > { %1156 = vmatmul.mubr.msk.bf16.vlgmr.msra.gmra.mrb[8].mxu1 %vm405_vm2, %v770_v39  ;;  %vm926_vm2 = vmand %vm924_vm0, %vm925_vm1 }
 0x869   : > { %v1157_v42 = vpop.f32.mrb[8].mxu1 }
 0x86a   : > { %v818_v43 = vpop.f32.mrb[9].mxu1  ;;  %v827_v49 = vadd.f32 %v1157_v42, %v774_v41 }
 0x86b   : > { %v819_v44 = vadd.f32 %v818_v43, %v774_v41  ;;  %v1158_v45 = vpop.f32.mrb[10].mxu1 }
 0x86c   : > { %v821_v46 = vpop.f32.mrb[11].mxu1  ;;  %v839_v52 = vmul.f32 0.2, %v827_v49  ;;  %v830_v53 = vadd.f32 %v1158_v45, %v774_v41  ;;  %vm835_vm7 = vcmp.gt.f32.partialorder %v827_v49, 0.0 }
 0x86d   : > { %v822_v47 = vadd.f32 %v821_v46, %v774_v41  ;;  %vm833_vm5 = vcmp.gt.f32.partialorder %v819_v44, 0.0  ;;  %v837_v48 = vmul.f32 0.2, %v819_v44 }
 0x86e   : > { %v840_v8 = vmul.f32 0.2, %v830_v53  ;;  %v843_v55 = vsel %vm835_vm7, %v827_v49, %v839_v52  ;;  %vm836_vm8 = vcmp.gt.f32.partialorder %v830_v53, 0.0 }
 0x86f   : > { %v838_v50 = vmul.f32 0.2, %v822_v47  ;;  %v841_v51 = vsel %vm833_vm5, %v819_v44, %v837_v48  ;;  %vm834_vm6 = vcmp.gt.f32.partialorder %v822_v47, 0.0 }
 0x870   : > { %845 = vxpose.xlu1.b32.start [1/4] (short) (narrow) %v841_v51, 8  ;;  %v844_v56 = vsel %vm836_vm8, %v830_v53, %v840_v8 }
 0x871   : > { %v842_v54 = vsel %vm834_vm6, %v822_v47, %v838_v50 }
 0x874   : > { %846 = vxpose.xlu1.b32.cont [2/4] (short) (narrow) %v842_v54, 8 }
 0x878   : > { %847 = vxpose.xlu1.b32.cont [3/4] (short) (narrow) %v843_v55, 8 }
 0x87c   : > { %848 = vxpose.xlu1.b32.end [4/4] (short) (narrow) %v844_v56, 8 }
 0x8f0   : > { %v861_v62 = vpop.trf.xlu1 }
 0x8f1   : > { %881 = vst.msk [vmem:[%s1658_s22] sm:$0x1] %vm1654_vm9, %v861_v62  ;;  %v889_v63 = vrot.slane %v861_v62, %v888_v60  ;;  %v928_v1 = vcombine.high %v861_v62, %v861_v62 }
 0x8f3   : > { %v890_v2 = vcombine.high %v889_v63, %v889_v63  ;;  %v935_v3 = vrot.slane %v928_v1, %v888_v60  ;;  %v897_v7 = vrot.slane %v889_v63, %v888_v60 }
 0x8f5   : > { %v912_v9 = vcombine.high %v897_v7, %v897_v7  ;;  %v904_v6 = vrot.slane %v890_v2, %v888_v60  ;;  %v945_v10 = vcombine.high %v935_v3, %v935_v3  ;;  %v942_v11 = vrot.slane %v935_v3, %v888_v60 }
 0x8f7   : > { %913 = vrot.lane.b32.xlu1 %v912_v9, %s1390_s11  ;;  %905 = vrot.lane.b32.xlu0 %v904_v6, %s1392_s27  ;;  %944 = vst.msk [vmem:[%s1658_s22 + $0x1] sm:$0x1] %vm1654_vm9, %v942_v11  ;;  %v952_v12 = vrot.slane %v945_v10, %v888_v60  ;;  %v957_v13 = vcombine.high %v942_v11, %v942_v11 }
 0x8f8   : > { %v920_v15 = vcombine.high %v904_v6, %v904_v6 }
 0x8f9   : > { %v962_v14 = vcombine.high %v952_v12, %v952_v12 }
 0x8fb   : > { %953 = vrot.lane.b32.xlu1 %v952_v12, %s1392_s27  ;;  %958 = vrot.lane.b32.xlu0 %v957_v13, %s1390_s11  ;;  %s1703_s11 = scalar_lea.hbm %s1755_s6, %s1093_s7 }
 0x8ff   : > { %963 = vrot.lane.b32.xlu0 %v962_v14, %s1389_s19  ;;  %921 = vrot.lane.b32.xlu1 %v920_v15, %s1389_s19 }
 0x969   : > { %v914_v19 = vpop.permute.xlu1 %913  ;;  %v906_v20 = vpop.permute.xlu0 %905 }
 0x96a   : > { %911 = vst.msk [vmem:[%s1658_s22] sm:$0x1] %vm910_vm14, %v906_v20 }
 0x96b   : > { %919 = vst.msk [vmem:[%s1658_s22] sm:$0x1] %vm918_vm15, %v914_v19 }
 0x96d   : > { %v954_v21 = vpop.permute.xlu1 %953  ;;  %v959_v22 = vpop.permute.xlu0 %958 }
 0x96e   : > { %956 = vst.msk [vmem:[%s1658_s22 + $0x1] sm:$0x1] %vm910_vm14, %v954_v21 }
 0x96f   : > { %961 = vst.msk [vmem:[%s1658_s22 + $0x1] sm:$0x1] %vm918_vm15, %v959_v22 }
 0x971   : > { %v964_v23 = vpop.permute.xlu0 %963  ;;  %v922_v5 = vpop.permute.xlu1 %921 }
 0x972   : > { %966 = vst.msk [vmem:[%s1658_s22 + $0x1] sm:$0x1] %vm926_vm2, %v964_v23  ;;  %927 = vst.msk [vmem:[%s1658_s22] sm:$0x1] %vm926_vm2, %v922_v5 }
 0x973   : > { %1324 = shalt.err (!%p1321_p7)
}
 0x974   : > { %s1325_s21 = scalar_lea.hbm %s1703_s11, 32  ;;  %s1329_s18 = scalar_lea.hbm %s1755_s6, 64 }
 0x975   : > { %p1326_p9 = scmp.ne.s32.totalorder %s1703_s11, %s1325_s21  ;;  %p1330_p0 = scmp.lt.u32.totalorder %s1703_s11, %s1755_s6 }
 0x976   : > { %p1331_p1 = scmp.lt.u32.totalorder %s1329_s18, %s1325_s21  ;;  %p1333_p4 = scmp.lt.u32.totalorder %s1325_s21, %s1703_s11 }
 0x977   : > { %p1327_p2 = pnand %p1326_p9, %p1523_p12 }
 0x978   : > { %p1332_p11 = por %p1331_p1, %p1330_p0 }
 0x979   : > { %p1328_p5 = pneg %p1327_p2 }
 0x97a   : > { %p1334_p6 = por %p1333_p4, %p1332_p11 }
 0x97c   : > { %p1335_p8 = pnand %p1334_p6, %p1328_p5 }
 0x97e   : > { %1338 = shalt.err (!%p1335_p8)
}
 0x97f   : > { %1172 = dma.vmem_to_hbm [thread:$0]  (%p1523_p12), %s1705_s28, 32, %s1703_s11, %s968_s12  }
 0x980 PF: > { %s994_s27 = sand.u32 1, %s1369_s23   ;;  %p1778_p10 = scmp.ne.s32.totalorder %s1760_s29, 0 }
 0x981   : > { %p1779_p13 = scmp.ge.s32.totalorder %s1381_s26, 2  ;;  %s995_s7 = scalar_lea.sflag [#allocation5], %s994_s27 }
 0x983   : > { %p1183_p3 = pnand %p1779_p13, %p1778_p10 }
 0x985   : > { %1364 = dma.done.wait (!%p1183_p3), %s995_s7, 32  }
 0x986   : > { %1366 = vsyncadd (!%p1183_p3), %s995_s7, 4294967264  ;;  %p21_p7 = scmp.ge.s32.totalorder %s1488_s10, 4   ;;  %s1780_s23 = smov %s1373_s24 }
 0x987   : > { %s1781_s24 = smov %s1377_s25  ;;  %s1782_s25 = smov %s1519_s13 }
 0x988   : > { %s1783_s26 = smov %s1488_s10  ;;  %23 = sbr.rel (!%p21_p7) target bundleno = 8 (0x8), region = 93 }
 0x98f   :  { %1000 = vsyncpa [#allocation4], 1 }
 0x990   :  { %1002 = vsyncpa [#allocation4 + $0x1], 1 }
 0x991   :  { %1003 = vsyncpa [#allocation7], 1 }
 0x992   :  { %1004 = vsyncpa [#allocation5], 1 }
 0x993   :  { %1006 = vsyncpa [#allocation5 + $0x1], 1 }

</bundles_post_ra>
